<compile_context>
chip_gen: v7x
topology: tpu7x:2x2x1
jax: 0.10.0
libtpu: 0.0.40
codegen_flags: <defaults>
</compile_context>

<pallas_src>
import functools

import jax
import jax.numpy as jnp
from jax import lax
from jax.experimental import pallas as pl
from jax.experimental.pallas import tpu as pltpu

LANES = 128
SUBLANES = 8
MAX_TILE_ROWS = 2048  # 2048 x 128 x 4B = 1 MiB per input block (f32)


def _round_up(x, m):
    return ((x + m - 1) // m) * m


def _mse_kernel(pred_ref, target_ref, out_ref, *, tile_rows, blocks_per_half,
                rows, needs_mask):
    """Accumulates per-lane partial sums of (target - pred)^2 into out_ref."""
    c = pl.program_id(0)  # "parallel" half (megacore split)
    i = pl.program_id(1)  # "arbitrary" reduction axis over row blocks

    @pl.when(i == 0)
    def _():
        out_ref[...] = jnp.zeros_like(out_ref)

    d = target_ref[...].astype(jnp.float32) - pred_ref[...].astype(jnp.float32)
    dd = d * d

    if needs_mask:
        # Mask rows that fall beyond the real array (ragged last block).
        blk = c * blocks_per_half + i
        row = blk * tile_rows + lax.broadcasted_iota(
            jnp.int32, (tile_rows, LANES), 0)
        dd = jnp.where(row < rows, dd, 0.0)

    # Fold (tile_rows, 128) -> (8, 128) with pure VPU adds; the expensive
    # cross-lane (XLU) reduction is deferred to the wrapper (runs once).
    out_ref[...] += dd.reshape(-1, SUBLANES, LANES).sum(axis=0)


def mse(pred, target):
    """Mean squared error, semantics of torch.mean((target - pred) ** 2)."""
    assert pred.shape == target.shape, "pred/target shapes must match"
    n = int(pred.size)
    if n == 0:
        return jnp.float32(jnp.nan)  # torch.mean of an empty tensor -> nan

    pred_f = jnp.ravel(pred)
    target_f = jnp.ravel(target)

    if n <= MAX_TILE_ROWS * LANES:
        # Small problem: a single block covers everything; pad it out to a
        # full (tile_rows, 128) slab (the copy is tiny, <= 1 MiB).
        tile_rows = _round_up(pl.cdiv(n, LANES), SUBLANES)
        padded_n = tile_rows * LANES
    else:
        # Large problem: pad only to the 128-lane boundary (<=127 elements,
        # and only when n % 128 != 0); the ragged last row-block is masked
        # inside the kernel instead of materializing a padded HBM copy.
        tile_rows = MAX_TILE_ROWS
        padded_n = _round_up(n, LANES)

    pad = padded_n - n
    if pad:
        pred_f = jnp.pad(pred_f, (0, pad))
        target_f = jnp.pad(target_f, (0, pad))

    rows = padded_n // LANES
    pred2d = pred_f.reshape(rows, LANES)
    target2d = target_f.reshape(rows, LANES)

    num_blocks = pl.cdiv(rows, tile_rows)
    # Split the row blocks across a size-2 "parallel" axis when they divide
    # evenly: ~2x on 2-TensorCore chips (v7x), a harmless serial loop on
    # single-core v5e/v6e.  Odd block counts just run unsplit.
    num_halves = 2 if (num_blocks >= 2 and num_blocks % 2 == 0) else 1
    blocks_per_half = num_blocks // num_halves
    needs_mask = (num_blocks * tile_rows) != rows

    kernel = functools.partial(
        _mse_kernel,
        tile_rows=tile_rows,
        blocks_per_half=blocks_per_half,
        rows=rows,
        needs_mask=needs_mask,
    )

    in_map = lambda c, i: (c * blocks_per_half + i, 0)

    partials = pl.pallas_call(
        kernel,
        out_shape=jax.ShapeDtypeStruct((num_halves * SUBLANES, LANES),
                                       jnp.float32),
        grid_spec=pltpu.PrefetchScalarGridSpec(
            num_scalar_prefetch=0,
            grid=(num_halves, blocks_per_half),
            in_specs=[
                pl.BlockSpec((tile_rows, LANES), in_map),
                pl.BlockSpec((tile_rows, LANES), in_map),
            ],
            out_specs=pl.BlockSpec((SUBLANES, LANES), lambda c, i: (c, 0)),
        ),
        compiler_params=pltpu.CompilerParams(
            dimension_semantics=("parallel", "arbitrary"),
        ),
    )(pred2d, target2d)

    # Single cross-lane reduction + divide by the true element count.
    return jnp.sum(partials) / jnp.float32(n)


if __name__ == "__main__":
    key = jax.random.PRNGKey(0)
    k1, k2, k3, k4 = jax.random.split(key, 4)

    # Small NCHW-like tensors (the loss itself is shape-agnostic).
    shape = (2, 4, 16, 16)
    pred = jax.random.normal(k1, shape, dtype=jnp.float32)
    target = jax.random.normal(k2, shape, dtype=jnp.float32)

    result = mse(pred, target)
    jax.block_until_ready(result)
    ref = jnp.mean((target - pred) ** 2)
    assert jnp.allclose(result, ref, rtol=1e-6, atol=1e-6), (result, ref)

    # A larger, non-tile-multiple case exercising the masked ragged tail and
    # the two-way (megacore) split path.
    shape2 = (600, 2500)
    pred2 = jax.random.normal(k3, shape2, dtype=jnp.float32)
    target2 = jax.random.normal(k4, shape2, dtype=jnp.float32)
    result2 = mse(pred2, target2)
    jax.block_until_ready(result2)
    ref2 = jnp.mean((target2 - pred2) ** 2)
    assert jnp.allclose(result2, ref2, rtol=1e-5, atol=1e-6), (result2, ref2)

    print("KERNEL_OK")
</pallas_src>

<mosaic_0001>
module attributes {stable_mosaic.version = 11 : i64} {
  func.func @_mse_kernel(%arg0: i32, %arg1: i32, %arg2: memref<16x128xf32, #tpu.memory_space<vmem>>, %arg3: memref<16x128xf32, #tpu.memory_space<vmem>>, %arg4: memref<8x128xf32, #tpu.memory_space<vmem>>) attributes {dimension_semantics = [#tpu.dimension_semantics<parallel>, #tpu.dimension_semantics<arbitrary>], iteration_bounds = array<i64: 1, 1>, scalar_prefetch = 0 : i64, scratch_operands = 0 : i64, tpu.core_type = #tpu.core_type<tc>, window_params = [{transform_indices = @transform_0, window_bounds = array<i64: 16, 128>}, {transform_indices = @transform_1, window_bounds = array<i64: 16, 128>}, {transform_indices = @transform_2, window_bounds = array<i64: 8, 128>}]} {
    %c0_i32 = arith.constant 0 : i32
    %0 = arith.cmpi eq, %arg1, %c0_i32 : i32
    %1 = arith.extui %0 : i1 to i32
    %c0_i32_0 = arith.constant 0 : i32
    %2 = arith.cmpi ne, %1, %c0_i32_0 : i32
    scf.if %2 {
      %cst_8 = arith.constant 0.000000e+00 : f32
      %12 = vector.broadcast %cst_8 : f32 to vector<8x128xf32>
      %c0_9 = arith.constant 0 : index
      %c0_10 = arith.constant 0 : index
      %13 = vector.load %arg4[%c0_9, %c0_10] : memref<8x128xf32, #tpu.memory_space<vmem>>, vector<8x128xf32>
      tpu.vector_store %arg4[%c0_9, %c0_10], %12 {strides = array<i32>} : memref<8x128xf32, #tpu.memory_space<vmem>>, vector<8x128xf32>,
    } else {
    }
    %c0 = arith.constant 0 : index
    %c0_1 = arith.constant 0 : index
    %3 = vector.load %arg3[%c0, %c0_1] : memref<16x128xf32, #tpu.memory_space<vmem>>, vector<16x128xf32>
    %c0_2 = arith.constant 0 : index
    %c0_3 = arith.constant 0 : index
    %4 = vector.load %arg2[%c0_2, %c0_3] : memref<16x128xf32, #tpu.memory_space<vmem>>, vector<16x128xf32>
    %5 = arith.subf %3, %4 : vector<16x128xf32>
    %6 = arith.mulf %5, %5 : vector<16x128xf32>
    %c0_4 = arith.constant 0 : index
    %c0_5 = arith.constant 0 : index
    %7 = vector.load %arg4[%c0_4, %c0_5] : memref<8x128xf32, #tpu.memory_space<vmem>>, vector<8x128xf32>
    %8 = vector.shape_cast %6 : vector<16x128xf32> to vector<2x8x128xf32>
    %cst = arith.constant dense<0.000000e+00> : vector<8x128xf32>
    %9 = vector.multi_reduction <add>, %8, %cst [0] : vector<2x8x128xf32> to vector<8x128xf32>
    %10 = arith.addf %7, %9 : vector<8x128xf32>
    %c0_6 = arith.constant 0 : index
    %c0_7 = arith.constant 0 : index
    %11 = vector.load %arg4[%c0_6, %c0_7] : memref<8x128xf32, #tpu.memory_space<vmem>>, vector<8x128xf32>
    tpu.vector_store %arg4[%c0_6, %c0_7], %10 {strides = array<i32>} : memref<8x128xf32, #tpu.memory_space<vmem>>, vector<8x128xf32>,
    return
  }
  func.func @transform_0(%arg0: i32, %arg1: i32) -> (i32, i32) {
    %c1_i32 = arith.constant 1 : i32
    %0 = arith.muli %arg0, %c1_i32 : i32
    %1 = arith.addi %0, %arg1 : i32
    %c0_i32 = arith.constant 0 : i32
    %c0_i32_0 = arith.constant 0 : i32
    return %1, %c0_i32 : i32, i32
  }
  func.func @transform_1(%arg0: i32, %arg1: i32) -> (i32, i32) {
    %c1_i32 = arith.constant 1 : i32
    %0 = arith.muli %arg0, %c1_i32 : i32
    %1 = arith.addi %0, %arg1 : i32
    %c0_i32 = arith.constant 0 : i32
    %c0_i32_0 = arith.constant 0 : i32
    return %1, %c0_i32 : i32, i32
  }
  func.func @transform_2(%arg0: i32, %arg1: i32) -> (i32, i32) {
    %c0_i32 = arith.constant 0 : i32
    %c0_i32_0 = arith.constant 0 : i32
    return %arg0, %c0_i32 : i32, i32
  }
}

</mosaic_0001>

<bundles_post_ra>
// kernel: tpu_custom_call.1
= control target key start
LH: loop header
LB: loop body
LE: loop exit
PB: predicated region body
PF: predicated region fallthrough
CT: control target
= control target key end

     0   :  { %7 = vsyncpa [#allocation3], 0  ;;  %s219_s0 = inlined_call_operand.hbm [shape: f32[16,128], index: 0, kind: input, shape index: {}]   ;;  %s220_s1 = inlined_call_operand.hbm [shape: f32[16,128], index: 1, kind: input, shape index: {}]   ;;  %s221_s2 = inlined_call_operand.hbm [shape: f32[8,128], index: 2, kind: output, shape index: {}]  }
   0x1   :  { %8 = vsyncpa [#allocation6], 0 }
   0x2   :  { %9 = vsyncpa [#allocation4], 0  ;;  %s163_s9 = smov [#allocation2]   ;;  %s91_s13 = scalar_lea.hbm %s219_s0, 256 }
   0x3   :  { %s19_s10 = sshll.u32 %s163_s9, 4  ;;  %p92_p0 = scmp.ne.s32.totalorder %s219_s0, %s91_s13  ;;  %s20_s10 = int_to_ptr.vmem [resolvable:$true] %s19_s10 }
   0x4   :  { %p95_p1 = scmp.lt.u32.totalorder %s91_s13, %s219_s0 }
   0x6   :  { %p97_p2 = pnand %p95_p1, %p92_p0 }
   0x8   :  { %100 = shalt.err (!%p97_p2)
}
   0x9   :  { %s101_s18 = scalar_lea.vmem %s20_s10, 256  ;;  %p106_p4 = scmp.lt.s32.totalorder %s20_s10, %s20_s10 }
   0xa   :  { %p102_p3 = scmp.ne.s32.totalorder %s20_s10, %s101_s18  ;;  %p107_p5 = scmp.lt.s32.totalorder %s101_s18, %s101_s18 }
   0xc   :  { %p108_p6 = por %p107_p5, %p106_p4 }
   0xe   :  { %p109_p7 = pnand %p108_p6, %p102_p3 }
  0x10   :  { %112 = shalt.err (!%p109_p7)
}
  0x11   :  { %s164_s19 = smov 128   ;;  %s165_s20 = smov 8  }
  0x12   :  { %25 = dma.hbm_to_vmem [thread:$0]  %s219_s0, 256, %s20_s10, [#allocation3], %s164_s19, %s164_s19, %s165_s20  }
  0x13   :  { %s166_s23 = smov [#allocation5]   ;;  %s113_s27 = scalar_lea.hbm %s220_s1, 256 }
  0x14   :  { %s35_s24 = sshll.u32 %s166_s23, 4  ;;  %p114_p8 = scmp.ne.s32.totalorder %s220_s1, %s113_s27  ;;  %s36_s24 = int_to_ptr.vmem [resolvable:$true] %s35_s24 }
  0x15   :  { %p117_p9 = scmp.lt.u32.totalorder %s113_s27, %s220_s1 }
  0x17   :  { %p119_p10 = pnand %p117_p9, %p114_p8 }
  0x19   :  { %122 = shalt.err (!%p119_p10)
}
  0x1a   :  { %s123_s4 = scalar_lea.vmem %s36_s24, 256  ;;  %p128_p12 = scmp.lt.s32.totalorder %s36_s24, %s36_s24 }
  0x1b   :  { %p124_p11 = scmp.ne.s32.totalorder %s36_s24, %s123_s4  ;;  %p129_p13 = scmp.lt.s32.totalorder %s123_s4, %s123_s4 }
  0x1d   :  { %p130_p0 = por %p129_p13, %p128_p12 }
  0x1f   :  { %p131_p1 = pnand %p130_p0, %p124_p11 }
  0x21   :  { %134 = shalt.err (!%p131_p1)
}
  0x22   :  { %41 = dma.hbm_to_vmem [thread:$0]  %s220_s1, 256, %s36_s24, [#allocation6], %s164_s19, %s164_s19, %s165_s20  }
  0x23   :  { %157 = dma.done.wait [#allocation3], 256  }
  0x24   :  { %158 = vsyncadd [#allocation3], 4294967040 }
  0x25   :  { %159 = dma.done.wait [#allocation6], 256  }
  0x26   :  { %160 = vsyncadd [#allocation6], 4294967040  ;;  %v57_v0 = vld [vmem:[#allocation5] sm:$0xff]  ;;  %v58_v1 = vld [vmem:[#allocation5 + $0x8] sm:$0xff]  ;;  %s167_s6 = smov [#allocation7]  }
  0x27   :  { %v59_v2 = vld [vmem:[#allocation2] sm:$0xff]  ;;  %v60_v3 = vld [vmem:[#allocation2 + $0x8] sm:$0xff]  ;;  %s75_s7 = sshll.u32 %s167_s6, 4  ;;  %s76_s7 = int_to_ptr.vmem [resolvable:$true] %s75_s7 }
  0x28   :  { %v61_v4 = vsub.f32 %v57_v0, %v59_v2  ;;  %v62_v5 = vsub.f32 %v58_v1, %v60_v3  ;;  %s135_s8 = scalar_lea.vmem %s76_s7, 128  ;;  %p140_p3 = scmp.lt.s32.totalorder %s76_s7, %s76_s7 }
  0x29   :  { %p136_p2 = scmp.ne.s32.totalorder %s76_s7, %s135_s8  ;;  %p141_p4 = scmp.lt.s32.totalorder %s135_s8, %s135_s8 }
  0x2a   :  { %v63_v6 = vmul.f32 %v61_v4, %v61_v4  ;;  %v64_v7 = vmul.f32 %v62_v5, %v62_v5 }
  0x2b   :  { %p142_p5 = por %p141_p4, %p140_p3 }
  0x2c   :  { %v66_v8 = vadd.f32 %v64_v7, %v63_v6 }
  0x2d   :  { %p143_p6 = pnand %p142_p5, %p136_p2 }
  0x2e   :  { %68 = vst [vmem:[#allocation7] sm:$0xff] %v66_v8 }
  0x2f   :  { %146 = shalt.err (!%p143_p6)
}
  0x30   :  { %s147_s10 = scalar_lea.hbm %s221_s2, 128 }
  0x31   :  { %p148_p7 = scmp.ne.s32.totalorder %s221_s2, %s147_s10  ;;  %p151_p8 = scmp.lt.u32.totalorder %s147_s10, %s221_s2 }
  0x33   :  { %p153_p9 = pnand %p151_p8, %p148_p7 }
  0x35   :  { %156 = shalt.err (!%p153_p9)
}
  0x36   :  { %78 = dma.vmem_to_hbm [thread:$0]  %s76_s7, 128, %s221_s2, [#allocation4]  }
  0x37   :  { %161 = dma.done.wait [#allocation4], 128  }
  0x38   :  { %162 = vsyncadd [#allocation4], 4294967168 }
  0x39   :  { %82 = vsyncpa [#allocation3], 1 }
  0x3a   :  { %83 = vsyncpa [#allocation6], 1 }
  0x3b   :  { %84 = vsyncpa [#allocation4], 1 }

</bundles_post_ra>
